<compile_context>
chip_gen: v7x
topology: tpu7x:2x2x1
jax: 0.10.0
libtpu: 0.0.40
codegen_flags: <defaults>
</compile_context>

<pallas_src>
import functools

import jax
import jax.numpy as jnp
from jax.experimental import pallas as pl
from jax.experimental.pallas import tpu as pltpu


# ----------------------------- Pallas kernel -----------------------------

def _fused_forward_kernel(a_t_ref, x0_t_ref, scale_ref,
                          msrc_ref, mdst_ref,
                          wsrc_ref, fsrc_ref,
                          wdst_ref, fdst_ref,
                          o_ref, *, num_layers_max):
    """Entire forward (feature_aggregation_method == 0) in one kernel.

    Transposed layout: features (D) along sublanes, nodes / edges along lanes.
      a_t:    (N_tot, N_tot)  block-diag A^T of the 3 normalized adjacencies
      x0_t:   (D, N_tot)      stacked embeddings, transposed
      scale:  (Lmax+1, N_tot) per-layer, per-graph coefficient (0 or 1/(L_g+1))
      msrc/mdst: (N_tot, E)   one-hot gather matrices (3 ones per column)
      wsrc/wdst: (D, F+1)     Linear weight with bias folded as last column
      fsrc/fdst: (F+1, E)     features^T with an all-ones last row
      o:      (1, E)          lane-dense score row
    """
    x = x0_t_ref[...]                                    # (D, N_tot)
    a_t = a_t_ref[...]                                   # (N_tot, N_tot)
    scales = scale_ref[...]                              # (Lmax+1, N_tot)

    # LightGCN propagation, all 3 graphs at once (block-diagonal A).
    acc = x * scales[0:1, :]
    for l in range(1, num_layers_max + 1):
        # X_l^T = X_{l-1}^T @ A^T
        x = jnp.dot(x, a_t, preferred_element_type=jnp.float32)
        acc = acc + x * scales[l:l + 1, :]

    # Per-edge gathers (emb_p[src] + emb_t[src] + emb_g[src]) as one-hot matmuls.
    src_sum = jnp.dot(acc, msrc_ref[...], preferred_element_type=jnp.float32)  # (D, E)
    dst_sum = jnp.dot(acc, mdst_ref[...], preferred_element_type=jnp.float32)  # (D, E)

    # Feature-engineering Linears (bias folded into augmented column / row).
    fe_src = jnp.dot(wsrc_ref[...], fsrc_ref[...], preferred_element_type=jnp.float32)
    fe_dst = jnp.dot(wdst_ref[...], fdst_ref[...], preferred_element_type=jnp.float32)

    out_src = (1.0 / 3.0) * src_sum + fe_src             # (D, E)
    out_dst = (1.0 / 3.0) * dst_sum + fe_dst             # (D, E)

    # Row-wise dot over D  ->  lane-dense (1, E) output (single contiguous store).
    o_ref[...] = jnp.sum(out_src * out_dst, axis=0, keepdims=True)


def fused_forward(a_t, x0_t, scales, msrc_t, mdst_t,
                  wsrc_aug, fsrc_aug_t, wdst_aug, fdst_aug_t, *, num_layers_max):
    e = msrc_t.shape[1]

    def full(shape):
        return pl.BlockSpec(shape, lambda i, _s=shape: (0,) * len(_s))

    out = pl.pallas_call(
        functools.partial(_fused_forward_kernel, num_layers_max=num_layers_max),
        out_shape=jax.ShapeDtypeStruct((1, e), jnp.float32),
        grid=(1,),
        in_specs=[full(a_t.shape), full(x0_t.shape), full(scales.shape),
                  full(msrc_t.shape), full(mdst_t.shape),
                  full(wsrc_aug.shape), full(fsrc_aug_t.shape),
                  full(wdst_aug.shape), full(fdst_aug_t.shape)],
        out_specs=pl.BlockSpec((1, e), lambda i: (0, 0)),
        compiler_params=pltpu.CompilerParams(
            dimension_semantics=("arbitrary",),
            # explicit (modest) scoped-VMEM limit; total footprint here is < 1 MiB
            vmem_limit_bytes=32 * 1024 * 1024,
        ),
    )(a_t, x0_t, scales, msrc_t, mdst_t, wsrc_aug, fsrc_aug_t, wdst_aug, fdst_aug_t)
    return out.reshape(e)


# ----------------------------- JAX glue (host-side preprocessing) -----------------------------

def build_norm_adj_T(edge_index, num_nodes):
    """A^T of torch_geometric LGConv's gcn_norm (add_self_loops=False).

    Forward conv is out[col] += dinv[row]*dinv[col] * x[row]  (out = A @ x with
    A[col,row] = norm), so the transposed kernel uses A^T[row,col] = norm.
    """
    row, col = edge_index[0], edge_index[1]
    ones = jnp.ones(row.shape[0], dtype=jnp.float32)
    deg = jnp.zeros((num_nodes,), jnp.float32).at[col].add(ones)
    dinv = jnp.where(deg > 0, 1.0 / jnp.sqrt(deg), 0.0)
    norm = dinv[row] * dinv[col]
    return jnp.zeros((num_nodes, num_nodes), jnp.float32).at[row, col].add(norm)


def block_diag3(a, b, c):
    na, nb, nc = a.shape[0], b.shape[0], c.shape[0]
    n = na + nb + nc
    m = jnp.zeros((n, n), jnp.float32)
    m = m.at[:na, :na].set(a)
    m = m.at[na:na + nb, na:na + nb].set(b)
    m = m.at[na + nb:, na + nb:].set(c)
    return m


def onehot_gather_T(idx_p, idx_t, idx_g, offs, n_tot):
    """(N_tot, E) matrix with 3 ones per column, so acc @ M == emb_p[i]+emb_t[i]+emb_g[i]."""
    e = idx_p.shape[0]
    cols = jnp.arange(e)
    m = jnp.zeros((n_tot, e), jnp.float32)
    m = m.at[offs[0] + idx_p, cols].add(1.0)
    m = m.at[offs[1] + idx_t, cols].add(1.0)
    m = m.at[offs[2] + idx_g, cols].add(1.0)
    return m


def build_layer_scales(layer_counts, node_counts):
    """(Lmax+1, N_tot): row l, node of graph g  ->  1/(L_g+1) if l <= L_g else 0."""
    l_max = max(layer_counts)
    rows = []
    for l in range(l_max + 1):
        parts = [jnp.full((n,), (1.0 / (L + 1)) if l <= L else 0.0, jnp.float32)
                 for L, n in zip(layer_counts, node_counts)]
        rows.append(jnp.concatenate(parts))
    return jnp.stack(rows, axis=0)


def xavier_uniform(key, shape):
    fan_out, fan_in = shape
    limit = (6.0 / (fan_in + fan_out)) ** 0.5
    return jax.random.uniform(key, shape, jnp.float32, -limit, limit)


def init_params(key, cfg):
    D = cfg["embedding_dim"]
    ks = jax.random.split(key, 8)
    return {
        "emb_problem": xavier_uniform(ks[0], (cfg["user_problem_nodes"], D)),
        "emb_test":    xavier_uniform(ks[1], (cfg["user_test_nodes"], D)),
        "emb_tag":     xavier_uniform(ks[2], (cfg["user_tag_nodes"], D)),
        # Linear weights kept in torch orientation [out_features, in_features]
        "w_src_fe": xavier_uniform(ks[3], (D, cfg["num_user_feature"])),
        "b_src_fe": jax.random.uniform(ks[4], (D,), jnp.float32, -0.1, 0.1),
        "w_dst_fe": xavier_uniform(ks[5], (D, cfg["num_item_feature"])),
        "b_dst_fe": jax.random.uniform(ks[6], (D,), jnp.float32, -0.1, 0.1),
    }


def heterogeneous_lightgcn_forward(params, cfg,
                                   user_problem_edge_index,
                                   user_test_edge_index,
                                   user_tag_edge_index,
                                   out_src_feature_engineering,
                                   out_dst_feature_engineering):
    L = cfg["feature_num_layers"]
    n_p = cfg["user_problem_nodes"]
    n_t = cfg["user_test_nodes"]
    n_g = cfg["user_tag_nodes"]
    n_tot = n_p + n_t + n_g
    e = out_src_feature_engineering.shape[0]

    # ---- host-side glue: int indices -> dense one-hot / block-diag operands ----
    a_t = block_diag3(build_norm_adj_T(user_problem_edge_index, n_p),
                      build_norm_adj_T(user_test_edge_index, n_t),
                      build_norm_adj_T(user_tag_edge_index, n_g))          # (N_tot, N_tot)
    x0_t = jnp.concatenate([params["emb_problem"], params["emb_test"],
                            params["emb_tag"]], axis=0).T                  # (D, N_tot)
    scales = build_layer_scales(L, (n_p, n_t, n_g))                        # (Lmax+1, N_tot)
    offs = (0, n_p, n_p + n_t)
    msrc_t = onehot_gather_T(user_problem_edge_index[0], user_test_edge_index[0],
                             user_tag_edge_index[0], offs, n_tot)          # (N_tot, E)
    mdst_t = onehot_gather_T(user_problem_edge_index[1], user_test_edge_index[1],
                             user_tag_edge_index[1], offs, n_tot)          # (N_tot, E)

    ones_row = jnp.ones((1, e), jnp.float32)
    wsrc_aug = jnp.concatenate([params["w_src_fe"], params["b_src_fe"][:, None]], axis=1)
    fsrc_aug_t = jnp.concatenate([out_src_feature_engineering.T, ones_row], axis=0)
    wdst_aug = jnp.concatenate([params["w_dst_fe"], params["b_dst_fe"][:, None]], axis=1)
    fdst_aug_t = jnp.concatenate([out_dst_feature_engineering.T, ones_row], axis=0)

    return fused_forward(a_t, x0_t, scales, msrc_t, mdst_t,
                         wsrc_aug, fsrc_aug_t, wdst_aug, fdst_aug_t,
                         num_layers_max=max(L))


# ----------------------------- pure-JAX reference (sanity check) -----------------------------

def _reference(params, cfg, upe, ute, utg, src_fe, dst_fe):
    L0, L1, L2 = cfg["feature_num_layers"]

    def build_a(edge_index, n):
        row, col = edge_index[0], edge_index[1]
        ones = jnp.ones(row.shape[0], jnp.float32)
        deg = jnp.zeros((n,), jnp.float32).at[col].add(ones)
        dinv = jnp.where(deg > 0, 1.0 / jnp.sqrt(deg), 0.0)
        norm = dinv[row] * dinv[col]
        return jnp.zeros((n, n), jnp.float32).at[col, row].add(norm)

    def prop(a, x, L):
        out = x / (L + 1)
        for _ in range(L):
            x = a @ x
            out = out + x / (L + 1)
        return out

    fe_s = src_fe @ params["w_src_fe"].T + params["b_src_fe"]
    fe_d = dst_fe @ params["w_dst_fe"].T + params["b_dst_fe"]
    op = prop(build_a(upe, cfg["user_problem_nodes"]), params["emb_problem"], L0)
    ot = prop(build_a(ute, cfg["user_test_nodes"]), params["emb_test"], L1)
    og = prop(build_a(utg, cfg["user_tag_nodes"]), params["emb_tag"], L2)
    out_src = (op[upe[0]] + ot[ute[0]] + og[utg[0]]) / 3.0 + fe_s
    out_dst = (op[upe[1]] + ot[ute[1]] + og[utg[1]]) / 3.0 + fe_d
    return jnp.sum(out_src * out_dst, axis=-1)


if __name__ == "__main__":
    cfg = {
        "user_problem_nodes": 48,
        "user_test_nodes": 40,
        "user_tag_nodes": 56,
        "embedding_dim": 32,
        "num_user_feature": 16,
        "num_item_feature": 12,
        "feature_num_layers": (2, 1, 3),   # CFG.feature_num_layers
        "feature_aggregation_method": 0,
    }
    E = 64  # number of interaction records (edges)

    key = jax.random.PRNGKey(0)
    k_param, k_e1, k_e2, k_e3, k_f1, k_f2 = jax.random.split(key, 6)
    params = init_params(k_param, cfg)

    upe = jax.random.randint(k_e1, (2, E), 0, cfg["user_problem_nodes"], dtype=jnp.int32)
    ute = jax.random.randint(k_e2, (2, E), 0, cfg["user_test_nodes"], dtype=jnp.int32)
    utg = jax.random.randint(k_e3, (2, E), 0, cfg["user_tag_nodes"], dtype=jnp.int32)
    src_fe = jax.random.normal(k_f1, (E, cfg["num_user_feature"]), jnp.float32)
    dst_fe = jax.random.normal(k_f2, (E, cfg["num_item_feature"]), jnp.float32)

    out = heterogeneous_lightgcn_forward(params, cfg, upe, ute, utg, src_fe, dst_fe)
    out = jax.block_until_ready(out)

    ref = _reference(params, cfg, upe, ute, utg, src_fe, dst_fe)
    assert out.shape == (E,)
    assert jnp.allclose(out, ref, atol=1e-4, rtol=1e-4)

    # TODO(synk): feature_aggregation_method 1/2/3 (elementwise / concat-Linear /
    # MultiheadAttention) branches are not exercised by the default forward and
    # are not implemented here.
    # TODO(synk): at production node counts, cast MXU operands to bf16 and tile
    # A over a row grid ("parallel" axis) to stay inside v7x's 64 MiB VMEM.
    print("KERNEL_OK")
</pallas_src>

<mosaic_0001>
module attributes {stable_mosaic.version = 11 : i64} {
  func.func @_fused_forward_kernel(%arg0: i32, %arg1: memref<144x144xf32, #tpu.memory_space<vmem>>, %arg2: memref<32x144xf32, #tpu.memory_space<vmem>>, %arg3: memref<4x144xf32, #tpu.memory_space<vmem>>, %arg4: memref<144x64xf32, #tpu.memory_space<vmem>>, %arg5: memref<144x64xf32, #tpu.memory_space<vmem>>, %arg6: memref<32x17xf32, #tpu.memory_space<vmem>>, %arg7: memref<17x64xf32, #tpu.memory_space<vmem>>, %arg8: memref<32x13xf32, #tpu.memory_space<vmem>>, %arg9: memref<13x64xf32, #tpu.memory_space<vmem>>, %arg10: memref<1x64xf32, #tpu.memory_space<vmem>>) attributes {dimension_semantics = [#tpu.dimension_semantics<arbitrary>], iteration_bounds = array<i64: 1>, scalar_prefetch = 0 : i64, scratch_operands = 0 : i64, tpu.core_type = #tpu.core_type<tc>, window_params = [{pipeline_mode = #tpu.pipeline_mode<synchronous>, transform_indices = @transform_0, window_bounds = array<i64: 144, 144>}, {pipeline_mode = #tpu.pipeline_mode<synchronous>, transform_indices = @transform_1, window_bounds = array<i64: 32, 144>}, {pipeline_mode = #tpu.pipeline_mode<synchronous>, transform_indices = @transform_2, window_bounds = array<i64: 4, 144>}, {pipeline_mode = #tpu.pipeline_mode<synchronous>, transform_indices = @transform_3, window_bounds = array<i64: 144, 64>}, {pipeline_mode = #tpu.pipeline_mode<synchronous>, transform_indices = @transform_4, window_bounds = array<i64: 144, 64>}, {pipeline_mode = #tpu.pipeline_mode<synchronous>, transform_indices = @transform_5, window_bounds = array<i64: 32, 17>}, {pipeline_mode = #tpu.pipeline_mode<synchronous>, transform_indices = @transform_6, window_bounds = array<i64: 17, 64>}, {pipeline_mode = #tpu.pipeline_mode<synchronous>, transform_indices = @transform_7, window_bounds = array<i64: 32, 13>}, {pipeline_mode = #tpu.pipeline_mode<synchronous>, transform_indices = @transform_8, window_bounds = array<i64: 13, 64>}, {pipeline_mode = #tpu.pipeline_mode<synchronous>, transform_indices = @transform_9, window_bounds = array<i64: 1, 64>}]} {
    %c0 = arith.constant 0 : index
    %c0_0 = arith.constant 0 : index
    %0 = vector.load %arg2[%c0, %c0_0] : memref<32x144xf32, #tpu.memory_space<vmem>>, vector<32x144xf32>
    %c0_1 = arith.constant 0 : index
    %c0_2 = arith.constant 0 : index
    %1 = vector.load %arg1[%c0_1, %c0_2] : memref<144x144xf32, #tpu.memory_space<vmem>>, vector<144x144xf32>
    %c0_3 = arith.constant 0 : index
    %c0_4 = arith.constant 0 : index
    %2 = vector.load %arg3[%c0_3, %c0_4] : memref<4x144xf32, #tpu.memory_space<vmem>>, vector<4x144xf32>
    %3 = vector.extract_strided_slice %2 {offsets = [0, 0], sizes = [1, 144], strides = [1, 1]} : vector<4x144xf32> to vector<1x144xf32>
    %4 = vector.broadcast %3 : vector<1x144xf32> to vector<32x144xf32>
    %5 = arith.mulf %0, %4 : vector<32x144xf32>
    %cst = arith.constant dense<0.000000e+00> : vector<32x144xf32>
    %6 = tpu.matmul %0, %1, %cst {dimension_numbers = #tpu.dot_dimension_numbers<[1], [0], [0], [1], [0, 0, 1, 1], [], []>} : vector<32x144xf32>, vector<144x144xf32>, vector<32x144xf32> -> vector<32x144xf32>
    %7 = vector.extract_strided_slice %2 {offsets = [1, 0], sizes = [1, 144], strides = [1, 1]} : vector<4x144xf32> to vector<1x144xf32>
    %8 = vector.broadcast %7 : vector<1x144xf32> to vector<32x144xf32>
    %9 = arith.mulf %6, %8 : vector<32x144xf32>
    %10 = arith.addf %5, %9 : vector<32x144xf32>
    %cst_5 = arith.constant dense<0.000000e+00> : vector<32x144xf32>
    %11 = tpu.matmul %6, %1, %cst_5 {dimension_numbers = #tpu.dot_dimension_numbers<[1], [0], [0], [1], [0, 0, 1, 1], [], []>} : vector<32x144xf32>, vector<144x144xf32>, vector<32x144xf32> -> vector<32x144xf32>
    %12 = vector.extract_strided_slice %2 {offsets = [2, 0], sizes = [1, 144], strides = [1, 1]} : vector<4x144xf32> to vector<1x144xf32>
    %13 = vector.broadcast %12 : vector<1x144xf32> to vector<32x144xf32>
    %14 = arith.mulf %11, %13 : vector<32x144xf32>
    %15 = arith.addf %10, %14 : vector<32x144xf32>
    %cst_6 = arith.constant dense<0.000000e+00> : vector<32x144xf32>
    %16 = tpu.matmul %11, %1, %cst_6 {dimension_numbers = #tpu.dot_dimension_numbers<[1], [0], [0], [1], [0, 0, 1, 1], [], []>} : vector<32x144xf32>, vector<144x144xf32>, vector<32x144xf32> -> vector<32x144xf32>
    %17 = vector.extract_strided_slice %2 {offsets = [3, 0], sizes = [1, 144], strides = [1, 1]} : vector<4x144xf32> to vector<1x144xf32>
    %18 = vector.broadcast %17 : vector<1x144xf32> to vector<32x144xf32>
    %19 = arith.mulf %16, %18 : vector<32x144xf32>
    %20 = arith.addf %15, %19 : vector<32x144xf32>
    %c0_7 = arith.constant 0 : index
    %c0_8 = arith.constant 0 : index
    %21 = vector.load %arg4[%c0_7, %c0_8] : memref<144x64xf32, #tpu.memory_space<vmem>>, vector<144x64xf32>
    %cst_9 = arith.constant dense<0.000000e+00> : vector<32x64xf32>
    %22 = tpu.matmul %20, %21, %cst_9 {dimension_numbers = #tpu.dot_dimension_numbers<[1], [0], [0], [1], [0, 0, 1, 1], [], []>} : vector<32x144xf32>, vector<144x64xf32>, vector<32x64xf32> -> vector<32x64xf32>
    %c0_10 = arith.constant 0 : index
    %c0_11 = arith.constant 0 : index
    %23 = vector.load %arg5[%c0_10, %c0_11] : memref<144x64xf32, #tpu.memory_space<vmem>>, vector<144x64xf32>
    %cst_12 = arith.constant dense<0.000000e+00> : vector<32x64xf32>
    %24 = tpu.matmul %20, %23, %cst_12 {dimension_numbers = #tpu.dot_dimension_numbers<[1], [0], [0], [1], [0, 0, 1, 1], [], []>} : vector<32x144xf32>, vector<144x64xf32>, vector<32x64xf32> -> vector<32x64xf32>
    %c0_13 = arith.constant 0 : index
    %c0_14 = arith.constant 0 : index
    %25 = vector.load %arg6[%c0_13, %c0_14] : memref<32x17xf32, #tpu.memory_space<vmem>>, vector<32x17xf32>
    %c0_15 = arith.constant 0 : index
    %c0_16 = arith.constant 0 : index
    %26 = vector.load %arg7[%c0_15, %c0_16] : memref<17x64xf32, #tpu.memory_space<vmem>>, vector<17x64xf32>
    %cst_17 = arith.constant dense<0.000000e+00> : vector<32x64xf32>
    %27 = tpu.matmul %25, %26, %cst_17 {dimension_numbers = #tpu.dot_dimension_numbers<[1], [0], [0], [1], [0, 0, 1, 1], [], []>} : vector<32x17xf32>, vector<17x64xf32>, vector<32x64xf32> -> vector<32x64xf32>
    %c0_18 = arith.constant 0 : index
    %c0_19 = arith.constant 0 : index
    %28 = vector.load %arg8[%c0_18, %c0_19] : memref<32x13xf32, #tpu.memory_space<vmem>>, vector<32x13xf32>
    %c0_20 = arith.constant 0 : index
    %c0_21 = arith.constant 0 : index
    %29 = vector.load %arg9[%c0_20, %c0_21] : memref<13x64xf32, #tpu.memory_space<vmem>>, vector<13x64xf32>
    %cst_22 = arith.constant dense<0.000000e+00> : vector<32x64xf32>
    %30 = tpu.matmul %28, %29, %cst_22 {dimension_numbers = #tpu.dot_dimension_numbers<[1], [0], [0], [1], [0, 0, 1, 1], [], []>} : vector<32x13xf32>, vector<13x64xf32>, vector<32x64xf32> -> vector<32x64xf32>
    %cst_23 = arith.constant 0.333333343 : f32
    %31 = vector.broadcast %cst_23 : f32 to vector<32x64xf32>
    %32 = arith.mulf %31, %22 : vector<32x64xf32>
    %33 = arith.addf %32, %27 : vector<32x64xf32>
    %cst_24 = arith.constant 0.333333343 : f32
    %34 = vector.broadcast %cst_24 : f32 to vector<32x64xf32>
    %35 = arith.mulf %34, %24 : vector<32x64xf32>
    %36 = arith.addf %35, %30 : vector<32x64xf32>
    %37 = arith.mulf %33, %36 : vector<32x64xf32>
    %cst_25 = arith.constant dense<0.000000e+00> : vector<64xf32>
    %38 = vector.multi_reduction <add>, %37, %cst_25 [0] : vector<32x64xf32> to vector<64xf32>
    %39 = vector.shape_cast %38 : vector<64xf32> to vector<1x64xf32>
    %c0_26 = arith.constant 0 : index
    %c0_27 = arith.constant 0 : index
    %40 = vector.load %arg10[%c0_26, %c0_27] : memref<1x64xf32, #tpu.memory_space<vmem>>, vector<1x64xf32>
    tpu.vector_store %arg10[%c0_26, %c0_27], %39 {strides = array<i32>} : memref<1x64xf32, #tpu.memory_space<vmem>>, vector<1x64xf32>,
    return
  }
  func.func @transform_0(%arg0: i32) -> (i32, i32) {
    %c0_i32 = arith.constant 0 : i32
    %c0_i32_0 = arith.constant 0 : i32
    %c0_i32_1 = arith.constant 0 : i32
    return %c0_i32, %c0_i32_0 : i32, i32
  }
  func.func @transform_1(%arg0: i32) -> (i32, i32) {
    %c0_i32 = arith.constant 0 : i32
    %c0_i32_0 = arith.constant 0 : i32
    %c0_i32_1 = arith.constant 0 : i32
    return %c0_i32, %c0_i32_0 : i32, i32
  }
  func.func @transform_2(%arg0: i32) -> (i32, i32) {
    %c0_i32 = arith.constant 0 : i32
    %c0_i32_0 = arith.constant 0 : i32
    %c0_i32_1 = arith.constant 0 : i32
    return %c0_i32, %c0_i32_0 : i32, i32
  }
  func.func @transform_3(%arg0: i32) -> (i32, i32) {
    %c0_i32 = arith.constant 0 : i32
    %c0_i32_0 = arith.constant 0 : i32
    %c0_i32_1 = arith.constant 0 : i32
    return %c0_i32, %c0_i32_0 : i32, i32
  }
  func.func @transform_4(%arg0: i32) -> (i32, i32) {
    %c0_i32 = arith.constant 0 : i32
    %c0_i32_0 = arith.constant 0 : i32
    %c0_i32_1 = arith.constant 0 : i32
    return %c0_i32, %c0_i32_0 : i32, i32
  }
  func.func @transform_5(%arg0: i32) -> (i32, i32) {
    %c0_i32 = arith.constant 0 : i32
    %c0_i32_0 = arith.constant 0 : i32
    %c0_i32_1 = arith.constant 0 : i32
    return %c0_i32, %c0_i32_0 : i32, i32
  }
  func.func @transform_6(%arg0: i32) -> (i32, i32) {
    %c0_i32 = arith.constant 0 : i32
    %c0_i32_0 = arith.constant 0 : i32
    %c0_i32_1 = arith.constant 0 : i32
    return %c0_i32, %c0_i32_0 : i32, i32
  }
  func.func @transform_7(%arg0: i32) -> (i32, i32) {
    %c0_i32 = arith.constant 0 : i32
    %c0_i32_0 = arith.constant 0 : i32
    %c0_i32_1 = arith.constant 0 : i32
    return %c0_i32, %c0_i32_0 : i32, i32
  }
  func.func @transform_8(%arg0: i32) -> (i32, i32) {
    %c0_i32 = arith.constant 0 : i32
    %c0_i32_0 = arith.constant 0 : i32
    %c0_i32_1 = arith.constant 0 : i32
    return %c0_i32, %c0_i32_0 : i32, i32
  }
  func.func @transform_9(%arg0: i32) -> (i32, i32) {
    %c0_i32 = arith.constant 0 : i32
    %c0_i32_0 = arith.constant 0 : i32
    %c0_i32_1 = arith.constant 0 : i32
    return %c0_i32, %c0_i32_0 : i32, i32
  }
}

</mosaic_0001>

<bundles_post_ra>
// kernel: tpu_custom_call.1
= control target key start
LH: loop header
LB: loop body
LE: loop exit
PB: predicated region body
PF: predicated region fallthrough
CT: control target
= control target key end

     0   :  { %vm105_vm0 = vcmask 130048   ;;  %s1790_s0 = inlined_call_operand.vmem [shape: f32[144,144], index: 0, kind: input, shape index: {}]   ;;  %s1791_s1 = inlined_call_operand.vmem [shape: f32[32,144], index: 1, kind: input, shape index: {}]   ;;  %s1792_s2 = inlined_call_operand.vmem [shape: f32[4,144], index: 2, kind: input, shape index: {}]   ;;  %s1793_s3 = inlined_call_operand.vmem [shape: f32[144,64], index: 3, kind: input, shape index: {}]   ;;  %s1794_s4 = inlined_call_operand.vmem [shape: f32[144,64], index: 4, kind: input, shape index: {}]   ;;  %s1795_s5 = inlined_call_operand.vmem [shape: f32[32,17], index: 5, kind: input, shape index: {}]   ;;  %s1796_s6 = inlined_call_operand.vmem [shape: f32[17,64], index: 6, kind: input, shape index: {}]   ;;  %s1797_s7 = inlined_call_operand.vmem [shape: f32[32,13], index: 7, kind: input, shape index: {}]   ;;  %s1798_s8 = inlined_call_operand.vmem [shape: f32[13,64], index: 8, kind: input, shape index: {}]   ;;  %s1799_s9 = inlined_call_operand.hbm [shape: f32[1,64], index: 9, kind: output, shape index: {}]  }
   0x1   :  { %v42_v0 = vld [vmem:[%s1790_s0 + $0x8] sm:$0xff]  ;;  %v44_v1 = vld [vmem:[%s1790_s0 + $0x18] sm:$0xff]  ;;  %v41_v2 = vld [vmem:[%s1790_s0] sm:$0xff] }
   0x2   :  { %v1322_v3 = vpack.c.bf16 %v44_v1, %v42_v0  ;;  %v43_v4 = vld [vmem:[%s1790_s0 + $0x10] sm:$0xff]  ;;  %v46_v5 = vld [vmem:[%s1790_s0 + $0x28] sm:$0xff]  ;;  %v48_v6 = vld [vmem:[%s1790_s0 + $0x38] sm:$0xff] }
   0x3   :  { %v1333_v7 = vpack.c.bf16 %v43_v4, %v41_v2  ;;  %v1335_v8 = vpack.c.bf16 %v48_v6, %v46_v5  ;;  %v45_v9 = vld [vmem:[%s1790_s0 + $0x20] sm:$0xff]  ;;  %v47_v10 = vld [vmem:[%s1790_s0 + $0x30] sm:$0xff]  ;;  %v50_v11 = vld [vmem:[%s1790_s0 + $0x48] sm:$0xff] }
   0x4   :  { %1062 = vmatprep.subr.bf16.mxu0 %v1322_v3  ;;  %v52_v12 = vld [vmem:[%s1790_s0 + $0x58] sm:$0xff]  ;;  %1098 = vmatprep.subr.bf16.mxu1 %v1322_v3  ;;  %v1352_v13 = vpack.c.bf16 %v47_v10, %v45_v9  ;;  %v49_v15 = vld [vmem:[%s1790_s0 + $0x40] sm:$0xff]  ;;  %v51_v16 = vld [vmem:[%s1790_s0 + $0x50] sm:$0xff] }
   0x5   :  { %1064 = vmatpush1.bf16.msra.mxu0 %v1333_v7  ;;  %1100 = vmatpush1.bf16.msra.mxu1 %v1333_v7  ;;  %v1356_v14 = vpack.c.bf16 %v52_v12, %v50_v11  ;;  %v54_v17 = vld [vmem:[%s1790_s0 + $0x68] sm:$0xff]  ;;  %v56_v18 = vld [vmem:[%s1790_s0 + $0x78] sm:$0xff]  ;;  %v1372_v19 = vpack.c.bf16 %v51_v16, %v49_v15  ;;  %v53_v21 = vld [vmem:[%s1790_s0 + $0x60] sm:$0xff] }
   0x6   :  { %1066 = vmatprep.subr.bf16.mxu0 %v1335_v8  ;;  %1102 = vmatprep.subr.bf16.mxu1 %v1335_v8  ;;  %v1376_v20 = vpack.c.bf16 %v56_v18, %v54_v17  ;;  %v55_v22 = vld [vmem:[%s1790_s0 + $0x70] sm:$0xff]  ;;  %v58_v23 = vld [vmem:[%s1790_s0 + $0x88] sm:$0xff]  ;;  %v60_v24 = vld [vmem:[%s1790_s0 + $0x98] sm:$0xff] }
   0x7   :  { %v1392_v25 = vpack.c.bf16 %v55_v22, %v53_v21  ;;  %v1397_v26 = vld [vmem:[%s1791_s1 + $0x8] sm:$0xff]  ;;  %v1401_v27 = vpack.c.bf16 %v60_v24, %v58_v23  ;;  %v57_v28 = vld [vmem:[%s1790_s0 + $0x80] sm:$0xff]  ;;  %v59_v29 = vld [vmem:[%s1790_s0 + $0x90] sm:$0xff] }
   0x8   :  { %996 = vmatprep.mubr.msk.f32.mxu0 %vm105_vm0, %v1397_v26  ;;  %v62_v30 = vld [vmem:[%s1790_s0 + $0xa8] sm:$0xff]  ;;  %v64_v31 = vld [vmem:[%s1790_s0 + $0xb8] sm:$0xff] }
   0x9   :  { %1068 = vmatpush1.bf16.msra.mxu0 %v1352_v13  ;;  %1104 = vmatpush1.bf16.msra.mxu1 %v1352_v13 }
   0xa   :  { %1070 = vmatprep.subr.bf16.mxu0 %v1356_v14  ;;  %1106 = vmatprep.subr.bf16.mxu1 %v1356_v14 }
   0xd   :  { %1072 = vmatpush1.bf16.msra.mxu0 %v1372_v19  ;;  %1108 = vmatpush1.bf16.msra.mxu1 %v1372_v19 }
   0xe   :  { %1074 = vmatprep.subr.bf16.mxu0 %v1376_v20  ;;  %1110 = vmatprep.subr.bf16.mxu1 %v1376_v20 }
   0xf   :  { %14 = vsyncpa [#allocation3], 0  ;;  %v1419_v32 = vpack.c.bf16 %v59_v29, %v57_v28  ;;  %v1423_v33 = vpack.c.bf16 %v64_v31, %v62_v30  ;;  %v61_v34 = vld [vmem:[%s1790_s0 + $0xa0] sm:$0xff]  ;;  %v63_v35 = vld [vmem:[%s1790_s0 + $0xb0] sm:$0xff]  ;;  %v79_v62 = vlaneseq  ;;  %vm749_vm1 = vcmask 1040384  }
  0x10   :  { %v66_v36 = vld [vmem:[%s1790_s0 + $0xc8] sm:$0xff]  ;;  %v68_v37 = vld [vmem:[%s1790_s0 + $0xd8] sm:$0xff]  ;;  %v1083_v38 = vpack.c.bf16 %v63_v35, %v61_v34  ;;  %v65_v40 = vld [vmem:[%s1790_s0 + $0xc0] sm:$0xff]  ;;  %vm857_vm2 = vcmask 1044480   ;;  %vm1261_vm3 = vmmov 1   ;;  %vm736_vm5 = vcmask 138240  }
  0x11   :  { %1076 = vmatpush1.bf16.msra.mxu0 %v1392_v25  ;;  %1112 = vmatpush1.bf16.msra.mxu1 %v1392_v25  ;;  %v1085_v39 = vpack.c.bf16 %v68_v37, %v66_v36  ;;  %v67_v41 = vld [vmem:[%s1790_s0 + $0xd0] sm:$0xff]  ;;  %v70_v42 = vld [vmem:[%s1790_s0 + $0xe8] sm:$0xff]  ;;  %v72_v43 = vld [vmem:[%s1790_s0 + $0xf8] sm:$0xff]  ;;  %v1510_v63 = vshrl.u32 %v79_v62, 7  ;;  %vm844_vm6 = vcmask 105472   ;;  %vm966_vm7 = vcmask 523264  }
  0x12   :  { %1078 = vmatprep.subr.bf16.mxu0 %v1401_v27  ;;  %1114 = vmatprep.subr.bf16.mxu1 %v1401_v27  ;;  %v1087_v44 = vpack.c.bf16 %v67_v41, %v65_v40  ;;  %v1089_v45 = vpack.c.bf16 %v72_v43, %v70_v42  ;;  %v69_v46 = vld [vmem:[%s1790_s0 + $0xe0] sm:$0xff]  ;;  %v71_v47 = vld [vmem:[%s1790_s0 + $0xf0] sm:$0xff]  ;;  %v74_v48 = vld [vmem:[%s1790_s0 + $0x108] sm:$0xff]  ;;  %vm980_vm8 = vcmask 516096  }
  0x13   :  { %v76_v49 = vld [vmem:[%s1790_s0 + $0x118] sm:$0xff]  ;;  %v1091_v50 = vpack.c.bf16 %v71_v47, %v69_v46  ;;  %v73_v52 = vld [vmem:[%s1790_s0 + $0x100] sm:$0xff]  ;;  %v75_v53 = vld [vmem:[%s1790_s0 + $0x110] sm:$0xff]  ;;  %v81_v0 = vsub.s32 0, %v1510_v63  ;;  %v85_v2 = vsub.s32 4, %v1510_v63  ;;  %v213_v4 = vsub.s32 5, %v1510_v63 }
  0x14   :  { %v1093_v51 = vpack.c.bf16 %v76_v49, %v74_v48  ;;  %v1095_v54 = vpack.c.bf16 %v75_v53, %v73_v52  ;;  %v33_v55 = vld [vmem:[%s1791_s1] sm:$0xff]  ;;  %v36_v56 = vld [vmem:[%s1791_s1 + $0x18] sm:$0xff]  ;;  %v35_v57 = vld [vmem:[%s1791_s1 + $0x10] sm:$0xff]  ;;  %v1260_v47 = vmov 0.0|0.0  }
  0x15   :  { %1080 = vmatpush1.bf16.msra.mxu0 %v1419_v32  ;;  %1116 = vmatpush1.bf16.msra.mxu1 %v1419_v32  ;;  %v38_v58 = vld [vmem:[%s1791_s1 + $0x28] sm:$0xff]  ;;  %v37_v59 = vld [vmem:[%s1791_s1 + $0x20] sm:$0xff]  ;;  %v1496_v60 = vld [vmem:[%s1791_s1 + $0x38] sm:$0xff] }
  0x16   :  { %1082 = vmatprep.subr.bf16.mxu0 %v1423_v33  ;;  %1118 = vmatprep.subr.bf16.mxu1 %v1423_v33  ;;  %v39_v61 = vld [vmem:[%s1791_s1 + $0x30] sm:$0xff]  ;;  %v1516_v1 = vld [vmem:[%s1792_s2] sm:$0xff]  ;;  %v512_v46 = vld [vmem:[%s1793_s3 + $0x8] sm:$0xff] }
  0x17   :  { %v82_v5 = vrot.slane %v1516_v1, %v81_v0  ;;  %v86_v6 = vrot.slane %v1516_v1, %v85_v2  ;;  %v513_v49 = vld [vmem:[%s1793_s3 + $0x10] sm:$0xff]  ;;  %v515_v52 = vld [vmem:[%s1793_s3 + $0x20] sm:$0xff]  ;;  %v516_v53 = vld [vmem:[%s1793_s3 + $0x28] sm:$0xff] }
  0x18   :  { %v522_v62 = vld [vmem:[%s1793_s3 + $0x58] sm:$0xff]  ;;  %v523_v2 = vld [vmem:[%s1793_s3 + $0x60] sm:$0xff]  ;;  %vm1733_vm4 = vmpackc.low %vm857_vm2, %vm1261_vm3 }
  0x19   :  { %1084 = vmatpush1.bf16.msra.mxu0 %v1083_v38  ;;  %1120 = vmatpush1.bf16.msra.mxu1 %v1083_v38  ;;  %v92_v9 = vrot.slane %v82_v5, %v81_v0  ;;  %v96_v10 = vrot.slane %v86_v6, %v81_v0  ;;  %v525_v5 = vld [vmem:[%s1793_s3 + $0x70] sm:$0xff]  ;;  %v526_v6 = vld [vmem:[%s1793_s3 + $0x78] sm:$0xff] }
  0x1a   :  { %1086 = vmatprep.subr.bf16.mxu0 %v1085_v39  ;;  %1122 = vmatprep.subr.bf16.mxu1 %v1085_v39 }
  0x1b   :  { %v100_v21 = vmul.f32 %v96_v10, %v36_v56  ;;  %v102_v29 = vmul.f32 %v96_v10, %v38_v58  ;;  %v103_v35 = vmul.f32 %v92_v9, %v39_v61  ;;  %v104_v37 = vmul.f32 %v96_v10, %v1496_v60 }
  0x1d   :  { %1088 = vmatpush1.bf16.msra.mxu0 %v1087_v44  ;;  %1124 = vmatpush1.bf16.msra.mxu1 %v1087_v44 }
  0x1e   :  { %1090 = vmatprep.subr.bf16.mxu0 %v1089_v45  ;;  %1126 = vmatprep.subr.bf16.mxu1 %v1089_v45 }
  0x21   :  { %1092 = vmatpush1.bf16.msra.mxu0 %v1091_v50  ;;  %1128 = vmatpush1.bf16.msra.mxu1 %v1091_v50 }
  0x22   :  { %1094 = vmatprep.subr.bf16.mxu0 %v1093_v51  ;;  %1130 = vmatprep.subr.bf16.mxu1 %v1093_v51 }
  0x25   :  { %1096 = vmatpush1.bf16.msra.mxu0 %v1095_v54  ;;  %1132 = vmatpush1.bf16.msra.mxu1 %v1095_v54 }
  0x26   :  { %1134 = vmatprep.subr.bf16.mxu0 %v1322_v3  ;;  %v209_v3 = vsub.s32 1, %v1510_v63  ;;  %1169 = vmatprep.subr.bf16.mxu1 %v1260_v47 }
  0x28   :  { %183 = vmatmul.mubr.f32.vlgmr.msra.gmra.mrb[0].mxu0 %v33_v55 }
  0x29   :  { %997 = vmatprep.mubr.msk.f32.mxu0 %vm105_vm0, %v36_v56  ;;  %1136 = vmatpush1.bf16.msra.mxu0 %v1333_v7  ;;  %v210_v7 = vrot.slane %v1516_v1, %v209_v3  ;;  %v518_v56 = vld [vmem:[%s1793_s3 + $0x38] sm:$0xff] }
  0x2a   :  { %1138 = vmatprep.subr.bf16.mxu0 %v1335_v8  ;;  %v214_v8 = vrot.slane %v1516_v1, %v213_v4 }
  0x2b   :  { %v220_v11 = vrot.slane %v210_v7, %v209_v3  ;;  %v1191_v7 = vpack.c.bf16 %v526_v6, %v525_v5  ;;  %v643_v5 = vld [vmem:[%s1794_s4 + $0x88] sm:$0xff] }
  0x2c   :  { %189 = vmatmul.mubr.f32.gmra.mrb[2].mxu0 %v35_v57  ;;  %v224_v12 = vrot.slane %v214_v8, %v209_v3  ;;  %v524_v3 = vld [vmem:[%s1793_s3 + $0x68] sm:$0xff]  ;;  %v344_v8 = vsub.s32 2, %v1510_v63 }
  0x2d   :  { %998 = vmatprep.mubr.msk.f32.mxu0 %vm105_vm0, %v38_v58  ;;  %1140 = vmatpush1.bf16.msra.mxu0 %v1352_v13  ;;  %v97_v13 = vmul.f32 %v92_v9, %v33_v55  ;;  %v517_v55 = vld [vmem:[%s1793_s3 + $0x30] sm:$0xff]  ;;  %v519_v58 = vld [vmem:[%s1793_s3 + $0x40] sm:$0xff]  ;;  %v1188_v4 = vpack.c.bf16 %v524_v3, %v523_v2  ;;  %v528_v2 = vld [vmem:[%s1793_s3 + $0x88] sm:$0xff] }
  0x2e   :  { %1142 = vmatprep.subr.bf16.mxu0 %v1356_v14  ;;  %v98_v14 = vmul.f32 %v96_v10, %v1397_v26  ;;  %v101_v26 = vmul.f32 %v92_v9, %v37_v59  ;;  %v345_v10 = vrot.slane %v1516_v1, %v344_v8  ;;  %v642_v3 = vld [vmem:[%s1794_s4 + $0x80] sm:$0xff] }
  0x2f   :  { %v1221_v6 = vpack.c.bf16 %v643_v5, %v642_v3 }
  0x30   :  { %195 = vmatmul.mubr.f32.gmra.mrb[4].mxu0 %v37_v59  ;;  %v520_v59 = vld [vmem:[%s1793_s3 + $0x48] sm:$0xff] }
  0x31   :  { %999 = vmatprep.mubr.msk.f32.mxu0 %vm105_vm0, %v1496_v60  ;;  %1144 = vmatpush1.bf16.msra.mxu0 %v1372_v19  ;;  %v99_v19 = vmul.f32 %v92_v9, %v35_v57  ;;  %v1179_v57 = vpack.c.bf16 %v518_v56, %v517_v55  ;;  %v1182_v60 = vpack.c.bf16 %v520_v59, %v519_v58  ;;  %v348_v9 = vsub.s32 6, %v1510_v63  ;;  %v636_v56 = vld [vmem:[%s1794_s4 + $0x50] sm:$0xff] }
  0x32   :  { %1146 = vmatprep.subr.bf16.mxu0 %v1376_v20 }
  0x34   :  { %201 = vmatmul.mubr.f32.gmra.mrb[6].mxu0 %v39_v61  ;;  %v521_v61 = vld [vmem:[%s1793_s3 + $0x50] sm:$0xff] }
  0x35   :  { %1148 = vmatpush1.bf16.msra.mxu0 %v1392_v25  ;;  %v1185_v0 = vpack.c.bf16 %v522_v62, %v521_v61  ;;  %v641_v61 = vld [vmem:[%s1794_s4 + $0x78] sm:$0xff] }
  0x36   :  { %1150 = vmatprep.subr.bf16.mxu0 %v1401_v27 }
  0x39   :  { %1152 = vmatpush1.bf16.msra.mxu0 %v1419_v32 }
  0x3a   :  { %1154 = vmatprep.subr.bf16.mxu0 %v1423_v33 }
  0x3d   :  { %1156 = vmatpush1.bf16.msra.mxu0 %v1083_v38 }
  0x3e   :  { %1158 = vmatprep.subr.bf16.mxu0 %v1085_v39 }
  0x41   :  { %1160 = vmatpush1.bf16.msra.mxu0 %v1087_v44 }
  0x42   :  { %1162 = vmatprep.subr.bf16.mxu0 %v1089_v45  ;;  %v511_v45 = vld [vmem:[%s1793_s3] sm:$0xff] }
  0x43   :  { %v1170_v48 = vpack.c.bf16 %v512_v46, %v511_v45 }
  0x45   :  { %1164 = vmatpush1.bf16.msra.mxu0 %v1091_v50  ;;  %v514_v50 = vld [vmem:[%s1793_s3 + $0x18] sm:$0xff] }
  0x46   :  { %1166 = vmatprep.subr.bf16.mxu0 %v1093_v51  ;;  %v1173_v51 = vpack.c.bf16 %v514_v50, %v513_v49 }
  0x49   :  { %1168 = vmatpush1.bf16.msra.mxu0 %v1095_v54  ;;  %v1176_v54 = vpack.c.bf16 %v516_v53, %v515_v52  ;;  %v634_v52 = vld [vmem:[%s1794_s4 + $0x40] sm:$0xff] }
  0x4a   :  { %1196 = vmatprep.subr.bf16.mxu0 %v1260_v47 }
  0xfb   :  { %v184_v15 = vpop.f32.mrb[0].mxu0 }
  0xfc   :  { %v225_v16 = vmul.f32 %v220_v11, %v184_v15  ;;  %v186_v17 = vpop.f32.mrb[1].mxu0 }
  0xfd   :  { %v226_v18 = vmul.f32 %v224_v12, %v186_v17  ;;  %1000 = vmatprep.mubr.msk.f32.mxu1 %vm105_vm0, %v186_v17 }
  0xfe   :  { %v1527_v20 = vadd.f32 %v225_v16, %v97_v13  ;;  %318 = vmatmul.mubr.f32.vlgmr.msra.gmra.mrb[0].mxu1 %v184_v15  ;;  %v626_v13 = vld [vmem:[%s1794_s4] sm:$0xff] }
  0xff   :  { %v1529_v22 = vadd.f32 %v226_v18, %v98_v14  ;;  %v190_v23 = vpop.f32.mrb[2].mxu0  ;;  %1171 = vmatpush1.bf16.msra.mxu1 %v1170_v48  ;;  %v627_v14 = vld [vmem:[%s1794_s4 + $0x8] sm:$0xff] }
 0x100   :  { %v227_v24 = vmul.f32 %v220_v11, %v190_v23  ;;  %v192_v25 = vpop.f32.mrb[3].mxu0  ;;  %1172 = vmatprep.subr.bf16.mxu1 %v1260_v47  ;;  %v1197_v17 = vpack.c.bf16 %v627_v14, %v626_v13 }
 0x101   :  { %v228_v27 = vmul.f32 %v224_v12, %v192_v25  ;;  %1001 = vmatprep.mubr.msk.f32.mxu1 %vm105_vm0, %v192_v25 }
 0x102   :  { %v1532_v28 = vadd.f32 %v227_v24, %v99_v19  ;;  %324 = vmatmul.mubr.f32.gmra.mrb[2].mxu1 %v190_v23  ;;  %v629_v23 = vld [vmem:[%s1794_s4 + $0x18] sm:$0xff] }
 0x103   :  { %v1534_v30 = vadd.f32 %v228_v27, %v100_v21  ;;  %v196_v31 = vpop.f32.mrb[4].mxu0  ;;  %1174 = vmatpush1.bf16.msra.mxu1 %v1173_v51  ;;  %v628_v21 = vld [vmem:[%s1794_s4 + $0x10] sm:$0xff] }
 0x104   :  { %v229_v32 = vmul.f32 %v220_v11, %v196_v31  ;;  %v198_v33 = vpop.f32.mrb[5].mxu0  ;;  %1175 = vmatprep.subr.bf16.mxu1 %v1260_v47 }
 0x105   :  { %v230_v34 = vmul.f32 %v224_v12, %v198_v33  ;;  %1002 = vmatprep.mubr.msk.f32.mxu1 %vm105_vm0, %v198_v33  ;;  %v630_v33 = vld [vmem:[%s1794_s4 + $0x20] sm:$0xff] }
 0x106   :  { %v1537_v36 = vadd.f32 %v229_v32, %v101_v26  ;;  %330 = vmatmul.mubr.f32.gmra.mrb[4].mxu1 %v196_v31 }
 0x107   :  { %v1540_v38 = vadd.f32 %v230_v34, %v102_v29  ;;  %v202_v39 = vpop.f32.mrb[6].mxu0  ;;  %1177 = vmatpush1.bf16.msra.mxu1 %v1176_v54  ;;  %v1200_v29 = vpack.c.bf16 %v629_v23, %v628_v21 }
 0x108   :  { %v231_v40 = vmul.f32 %v220_v11, %v202_v39  ;;  %v204_v41 = vpop.f32.mrb[7].mxu0  ;;  %1178 = vmatprep.subr.bf16.mxu1 %v1260_v47  ;;  %v349_v11 = vrot.slane %v1516_v1, %v348_v9  ;;  %v479_v9 = vsub.s32 3, %v1510_v63 }
 0x109   :  { %v232_v42 = vmul.f32 %v224_v12, %v204_v41  ;;  %1003 = vmatprep.mubr.msk.f32.mxu1 %vm105_vm0, %v204_v41  ;;  %v355_v12 = vrot.slane %v345_v10, %v344_v8  ;;  %v483_v10 = vsub.s32 7, %v1510_v63  ;;  %v735_v63 = vld [vmem:[%s1796_s6 + $0x10] sm:$0x1] }
 0x10a   :  { %v1543_v43 = vadd.f32 %v231_v40, %v103_v35  ;;  %336 = vmatmul.mubr.f32.gmra.mrb[6].mxu1 %v202_v39  ;;  %v359_v15 = vrot.slane %v349_v11, %v344_v8  ;;  %v480_v11 = vrot.slane %v1516_v1, %v479_v9 }
 0x10b   :  { %v1545_v44 = vadd.f32 %v232_v42, %v104_v37  ;;  %1180 = vmatpush1.bf16.msra.mxu1 %v1179_v57  ;;  %v632_v42 = vld [vmem:[%s1794_s4 + $0x30] sm:$0xff]  ;;  %v637_v57 = vld [vmem:[%s1794_s4 + $0x58] sm:$0xff] }
 0x10c   :  { %1181 = vmatprep.subr.bf16.mxu1 %v1260_v47  ;;  %v1212_v58 = vpack.c.bf16 %v637_v57, %v636_v56  ;;  %v490_v13 = vrot.slane %v480_v11, %v479_v9 }
 0x10f   :  { %1183 = vmatpush1.bf16.msra.mxu1 %v1182_v60  ;;  %v640_v60 = vld [vmem:[%s1794_s4 + $0x70] sm:$0xff] }
 0x110   :  { %1184 = vmatprep.subr.bf16.mxu1 %v1260_v47  ;;  %v1218_v62 = vpack.c.bf16 %v641_v61, %v640_v60 }
 0x113   :  { %1186 = vmatpush1.bf16.msra.mxu1 %v1185_v0  ;;  %v527_v0 = vld [vmem:[%s1793_s3 + $0x80] sm:$0xff] }
 0x114   :  { %1187 = vmatprep.subr.bf16.mxu1 %v1260_v47 }
 0x117   :  { %1189 = vmatpush1.bf16.msra.mxu1 %v1188_v4  ;;  %v1194_v4 = vpack.c.bf16 %v528_v2, %v527_v0 }
 0x118   :  { %1190 = vmatprep.subr.bf16.mxu1 %v1260_v47 }
 0x11b   :  { %1192 = vmatpush1.bf16.msra.mxu1 %v1191_v7  ;;  %v733_v7 = vld [vmem:[%s1796_s6] sm:$0xff] }
 0x11c   :  { %1193 = vmatprep.subr.bf16.mxu1 %v1260_v47 }
 0x11f   :  { %1195 = vmatpush1.bf16.msra.mxu1 %v1194_v4 }
 0x1d1   :  { %v319_v16 = vpop.f32.mrb[0].mxu1 }
 0x1d2   :  { %v360_v18 = vmul.f32 %v355_v12, %v319_v16  ;;  %v321_v19 = vpop.f32.mrb[1].mxu1 }
 0x1d3   :  { %v361_v24 = vmul.f32 %v359_v15, %v321_v19  ;;  %1004 = vmatprep.mubr.msk.f32.mxu0 %vm105_vm0, %v321_v19 }
 0x1d4   :  { %v1623_v25 = vadd.f32 %v360_v18, %v1527_v20  ;;  %453 = vmatmul.mubr.f32.vlgmr.msra.gmra.mrb[8].mxu0 %v319_v16  ;;  %v631_v20 = vld [vmem:[%s1794_s4 + $0x28] sm:$0xff] }
 0x1d5   :  { %v1626_v27 = vadd.f32 %v361_v24, %v1529_v22  ;;  %v325_v26 = vpop.f32.mrb[2].mxu1  ;;  %1198 = vmatpush1.bf16.msra.mxu0 %v1197_v17  ;;  %v1203_v39 = vpack.c.bf16 %v631_v20, %v630_v33 }
 0x1d6   :  { %v362_v31 = vmul.f32 %v355_v12, %v325_v26  ;;  %v327_v32 = vpop.f32.mrb[3].mxu1  ;;  %1199 = vmatprep.subr.bf16.mxu0 %v1260_v47 }
 0x1d7   :  { %v363_v34 = vmul.f32 %v359_v15, %v327_v32  ;;  %1005 = vmatprep.mubr.msk.f32.mxu0 %vm105_vm0, %v327_v32 }
 0x1d8   :  { %v1637_v22 = vadd.f32 %v362_v31, %v1532_v28  ;;  %459 = vmatmul.mubr.f32.gmra.mrb[10].mxu0 %v325_v26  ;;  %v633_v28 = vld [vmem:[%s1794_s4 + $0x38] sm:$0xff] }
 0x1d9   :  { %v1640_v35 = vadd.f32 %v363_v34, %v1534_v30  ;;  %v331_v37 = vpop.f32.mrb[4].mxu1  ;;  %1201 = vmatpush1.bf16.msra.mxu0 %v1200_v29  ;;  %v1206_v49 = vpack.c.bf16 %v633_v28, %v632_v42 }
 0x1da   :  { %v364_v40 = vmul.f32 %v355_v12, %v331_v37  ;;  %v333_v41 = vpop.f32.mrb[5].mxu1  ;;  %1202 = vmatprep.subr.bf16.mxu0 %v1260_v47 }
 0x1db   :  { %v365_v45 = vmul.f32 %v359_v15, %v333_v41  ;;  %1006 = vmatprep.mubr.msk.f32.mxu0 %vm105_vm0, %v333_v41 }
 0x1dc   :  { %v1651_v30 = vadd.f32 %v364_v40, %v1537_v36  ;;  %465 = vmatmul.mubr.f32.gmra.mrb[12].mxu0 %v331_v37  ;;  %v635_v36 = vld [vmem:[%s1794_s4 + $0x48] sm:$0xff] }
 0x1dd   :  { %v1654_v46 = vadd.f32 %v365_v45, %v1540_v38  ;;  %v337_v48 = vpop.f32.mrb[6].mxu1  ;;  %1204 = vmatpush1.bf16.msra.mxu0 %v1203_v39  ;;  %v1209_v55 = vpack.c.bf16 %v635_v36, %v634_v52  ;;  %v839_v52 = vld [vmem:[%s1797_s7 + $0x8] sm:$0xff]  ;;  %v840_v36 = vld [vmem:[%s1797_s7 + $0x10] sm:$0xff] }
 0x1de   :  { %v366_v50 = vmul.f32 %v355_v12, %v337_v48  ;;  %v339_v51 = vpop.f32.mrb[7].mxu1  ;;  %1205 = vmatprep.subr.bf16.mxu0 %v1260_v47  ;;  %v484_v12 = vrot.slane %v1516_v1, %v483_v10  ;;  %v842_v1 = vld [vmem:[%s1798_s8] sm:$0xff] }
 0x1df   :  { %v367_v53 = vmul.f32 %v359_v15, %v339_v51  ;;  %1007 = vmatprep.mubr.msk.f32.mxu0 %vm105_vm0, %v339_v51  ;;  %v838_v51 = vld [vmem:[%s1797_s7] sm:$0xff] }
 0x1e0   :  { %v1665_v38 = vadd.f32 %v366_v50, %v1543_v43  ;;  %471 = vmatmul.mubr.f32.gmra.mrb[14].mxu0 %v337_v48  ;;  %v638_v43 = vld [vmem:[%s1794_s4 + $0x60] sm:$0xff]  ;;  %v494_v14 = vrot.slane %v484_v12, %v479_v9  ;;  %v730_v48 = vld [vmem:[%s1795_s5 + $0x8] sm:$0xff]  ;;  %v732_v50 = vld [vmem:[%s1795_s5 + $0x18] sm:$0xff] }
 0x1e1   :  { %v1668_v54 = vadd.f32 %v367_v53, %v1545_v44  ;;  %1207 = vmatpush1.bf16.msra.mxu0 %v1206_v49  ;;  %v639_v44 = vld [vmem:[%s1794_s4 + $0x68] sm:$0xff]  ;;  %v731_v49 = vld [vmem:[%s1795_s5 + $0x10] sm:$0xff]  ;;  %v841_v53 = vld [vmem:[%s1797_s7 + $0x18] sm:$0xff] }
 0x1e2   :  { %1208 = vmatprep.subr.bf16.mxu0 %v1260_v47  ;;  %v1215_v59 = vpack.c.bf16 %v639_v44, %v638_v43 }
 0x1e5   :  { %1210 = vmatpush1.bf16.msra.mxu0 %v1209_v55 }
 0x1e6   :  { %1211 = vmatprep.subr.bf16.mxu0 %v1260_v47 }
 0x1e9   :  { %1213 = vmatpush1.bf16.msra.mxu0 %v1212_v58 }
 0x1ea   :  { %1214 = vmatprep.subr.bf16.mxu0 %v1260_v47 }
 0x1ed   :  { %1216 = vmatpush1.bf16.msra.mxu0 %v1215_v59 }
 0x1ee   :  { %1217 = vmatprep.subr.bf16.mxu0 %v1260_v47 }
 0x1f1   :  { %1219 = vmatpush1.bf16.msra.mxu0 %v1218_v62 }
 0x1f2   :  { %1220 = vmatprep.subr.bf16.mxu0 %v1260_v47  ;;  %v734_v47 = vld [vmem:[%s1796_s6 + $0x8] sm:$0xff] }
 0x1f3   :  { %v1223_v8 = vpack.c.bf16 %v734_v47, %v733_v7 }
 0x1f5   :  { %1222 = vmatpush1.bf16.msra.mxu0 %v1221_v6  ;;  %1224 = vmatprep.subr.bf16.mxu1 %v1223_v8 }
 0x2a7   :  { %v454_v15 = vpop.f32.mrb[8].mxu0 }
 0x2a8   :  { %v495_v16 = vmul.f32 %v490_v13, %v454_v15  ;;  %v456_v17 = vpop.f32.mrb[9].mxu0 }
 0x2a9   :  { %v496_v18 = vmul.f32 %v494_v14, %v456_v17 }
 0x2aa   :  { %v503_v19 = vadd.f32 %v495_v16, %v1623_v25  ;;  %v843_v25 = vld [vmem:[%s1798_s8 + $0x8] sm:$0x1f] }
 0x2ab   :  { %v504_v21 = vadd.f32 %v496_v18, %v1626_v27  ;;  %v460_v23 = vpop.f32.mrb[10].mxu0  ;;  %v1227_v34 = vpack.c.bf16 %v843_v25, %v842_v1 }
 0x2ac   :  { %v497_v24 = vmul.f32 %v490_v13, %v460_v23  ;;  %v462_v26 = vpop.f32.mrb[11].mxu0 }
 0x2ad   :  { %v498_v29 = vmul.f32 %v494_v14, %v462_v26  ;;  %1008 = vmatprep.mubr.msk.f32.mxu1 %vm105_vm0, %v504_v21  ;;  %1012 = vmatprep.mubr.msk.f32.mxu0 %vm105_vm0, %v504_v21 }
 0x2ae   :  { %v505_v27 = vadd.f32 %v497_v24, %v1637_v22  ;;  %606 = vmatmul.mubr.f32.vlgmr.msra.gmra.mrb[8].mxu1 %v503_v19  ;;  %709 = vmatmul.mubr.f32.vlgmr.msra.gmra.mrb[16].mxu0 %v503_v19 }
 0x2af   :  { %v506_v31 = vadd.f32 %v498_v29, %v1640_v35  ;;  %1226 = vmatpush3.bf16.msra.mxu1 %v1223_v8  ;;  %v466_v32 = vpop.f32.mrb[12].mxu0 }
 0x2b0   :  { %v499_v33 = vmul.f32 %v490_v13, %v466_v32  ;;  %v468_v20 = vpop.f32.mrb[13].mxu0  ;;  %1043 = vmatprep.subr.msk.mxu1 %vm749_vm1, %v735_v63 }
 0x2b1   :  { %v500_v37 = vmul.f32 %v494_v14, %v468_v20  ;;  %1009 = vmatprep.mubr.msk.f32.mxu1 %vm105_vm0, %v506_v31  ;;  %1013 = vmatprep.mubr.msk.f32.mxu0 %vm105_vm0, %v506_v31 }
 0x2b2   :  { %v507_v39 = vadd.f32 %v499_v33, %v1651_v30  ;;  %611 = vmatmul.mubr.f32.gmra.mrb[10].mxu1 %v505_v27  ;;  %714 = vmatmul.mubr.f32.gmra.mrb[18].mxu0 %v505_v27 }
 0x2b3   :  { %v508_v35 = vadd.f32 %v500_v37, %v1654_v46  ;;  %v472_v40 = vpop.f32.mrb[14].mxu0  ;;  %1044 = vmatpush3.msk.msra.mxu1 %vm749_vm1, %v735_v63  ;;  %v729_v46 = vld [vmem:[%s1795_s5] sm:$0xff]  ;;  %s1262_s5 = smov [#allocation2]  }
 0x2b4   :  { %v501_v41 = vmul.f32 %v490_v13, %v472_v40  ;;  %v474_v42 = vpop.f32.mrb[15].mxu0  ;;  %1229 = vmatprep.subr.msk.bf16.mxu1 %vm1733_vm4, %v1227_v34  ;;  %s988_s7 = sshll.u32 %s1262_s5, 4  ;;  %s989_s7 = int_to_ptr.vmem [resolvable:$true] %s988_s7 }
 0x2b5   :  { %v502_v28 = vmul.f32 %v494_v14, %v474_v42  ;;  %1010 = vmatprep.mubr.msk.f32.mxu1 %vm105_vm0, %v508_v35  ;;  %1014 = vmatprep.mubr.msk.f32.mxu0 %vm105_vm0, %v508_v35  ;;  %s1236_s1 = scalar_lea.vmem %s989_s7, 16  ;;  %s1240_s12 = scalar_lea.vmem %s989_s7, 32 }
 0x2b6   :  { %v509_v45 = vadd.f32 %v501_v41, %v1665_v38  ;;  %616 = vmatmul.mubr.f32.gmra.mrb[12].mxu1 %v507_v39  ;;  %719 = vmatmul.mubr.f32.gmra.mrb[20].mxu0 %v507_v39  ;;  %p1237_p0 = scmp.ne.s32.totalorder %s989_s7, %s1236_s1  ;;  %p1241_p1 = scmp.lt.s32.totalorder %s989_s7, %s989_s7 }
 0x2b7   :  { %v510_v30 = vadd.f32 %v502_v28, %v1668_v54  ;;  %p1242_p2 = scmp.lt.s32.totalorder %s1240_s12, %s1236_s1 }
 0x2b9   :  { %1011 = vmatprep.mubr.msk.f32.mxu1 %vm105_vm0, %v510_v30  ;;  %1015 = vmatprep.mubr.msk.f32.mxu0 %vm105_vm0, %v510_v30  ;;  %p1243_p3 = por %p1242_p2, %p1241_p1 }
 0x2ba   :  { %621 = vmatmul.mubr.f32.gmra.mrb[14].mxu1 %v509_v45  ;;  %724 = vmatmul.mubr.f32.gmra.mrb[22].mxu0 %v509_v45 }
 0x2bb   :  { %1045 = vmatprep.mubr.msk.f32.mxu1 %vm736_vm5, %v729_v46  ;;  %p1244_p4 = pnand %p1243_p3, %p1237_p0 }
 0x2be   :  { %1046 = vmatmul.mubr.msk.f32.vlgmr.msra.gmra.mrb[16].mxu1 %vm736_vm5, %v730_v48 }
 0x2bf   :  { %1232 = vmatpush3.bf16.msk.msra.mxu1 %vm1733_vm4, %v1227_v34  ;;  %1048 = vmatprep.mubr.msk.f32.mxu1 %vm736_vm5, %v731_v49 }
 0x2c2   :  { %1049 = vmatmul.mubr.msk.f32.gmra.mrb[18].mxu1 %vm736_vm5, %v732_v50 }
 0x2c3   :  { %1055 = vmatprep.mubr.msk.f32.mxu1 %vm844_vm6, %v838_v51 }
 0x2c6   :  { %1056 = vmatmul.mubr.msk.f32.vlgmr.msra.gmra.mrb[20].mxu1 %vm844_vm6, %v839_v52 }
 0x2c7   :  { %1058 = vmatprep.mubr.msk.f32.mxu1 %vm844_vm6, %v840_v36 }
 0x2ca   :  { %1059 = vmatmul.mubr.msk.f32.gmra.mrb[22].mxu1 %vm844_vm6, %v841_v53 }
 0x381   :  { %v607_v38 = vpop.f32.mrb[8].mxu1  ;;  %v710_v54 = vpop.f32.mrb[16].mxu0 }
 0x382   :  { %v609_v55 = vpop.f32.mrb[9].mxu1  ;;  %v712_v56 = vpop.f32.mrb[17].mxu0  ;;  %v946_v6 = vmul.f32 0.33333334, %v607_v38  ;;  %v954_v17 = vmul.f32 0.33333334, %v710_v54 }
 0x385   :  { %v612_v57 = vpop.f32.mrb[10].mxu1  ;;  %v715_v58 = vpop.f32.mrb[18].mxu0 }
 0x386   :  { %v614_v43 = vpop.f32.mrb[11].mxu1  ;;  %v717_v44 = vpop.f32.mrb[19].mxu0  ;;  %v947_v5 = vmul.f32 0.33333334, %v612_v57  ;;  %v955_v16 = vmul.f32 0.33333334, %v715_v58 }
 0x389   :  { %v617_v59 = vpop.f32.mrb[12].mxu1  ;;  %v720_v60 = vpop.f32.mrb[20].mxu0 }
 0x38a   :  { %v619_v61 = vpop.f32.mrb[13].mxu1  ;;  %v722_v62 = vpop.f32.mrb[21].mxu0  ;;  %v948_v11 = vmul.f32 0.33333334, %v617_v59  ;;  %v956_v29 = vmul.f32 0.33333334, %v720_v60 }
 0x38d   :  { %v622_v0 = vpop.f32.mrb[14].mxu1  ;;  %v725_v2 = vpop.f32.mrb[22].mxu0 }
 0x38e   :  { %v624_v3 = vpop.f32.mrb[15].mxu1  ;;  %v727_v4 = vpop.f32.mrb[23].mxu0  ;;  %v949_v10 = vmul.f32 0.33333334, %v622_v0  ;;  %v957_v24 = vmul.f32 0.33333334, %v725_v2 }
 0x391   :  { %v1047_v7 = vpop.f32.mrb[16].mxu1 }
 0x392   :  { %v951_v47 = vadd.f32 %v1047_v7, %v947_v5  ;;  %v819_v8 = vpop.f32.mrb[17].mxu1 }
 0x393   :  { %v950_v9 = vadd.f32 %v946_v6, %v819_v8 }
 0x395   :  { %v1050_v12 = vpop.f32.mrb[18].mxu1 }
 0x396   :  { %v953_v13 = vadd.f32 %v1050_v12, %v949_v10  ;;  %v829_v14 = vpop.f32.mrb[19].mxu1 }
 0x397   :  { %v952_v15 = vadd.f32 %v948_v11, %v829_v14 }
 0x399   :  { %v1057_v18 = vpop.f32.mrb[20].mxu1 }
 0x39a   :  { %v959_v19 = vadd.f32 %v1057_v18, %v955_v16  ;;  %v927_v21 = vpop.f32.mrb[21].mxu1 }
 0x39b   :  { %v958_v23 = vadd.f32 %v954_v17, %v927_v21 }
 0x39c   :  { %v963_v26 = vmul.f32 %v959_v19, %v951_v47 }
 0x39d   :  { %v962_v63 = vmul.f32 %v958_v23, %v950_v9  ;;  %v1060_v1 = vpop.f32.mrb[22].mxu1 }
 0x39e   :  { %v968_v25 = vsel %vm966_vm7, %v963_v26, 0.0  ;;  %v961_v27 = vadd.f32 %v1060_v1, %v957_v24  ;;  %v937_v31 = vpop.f32.mrb[23].mxu1 }
 0x39f   :  { %v967_v32 = vsel %vm966_vm7, %v962_v63, 0.0  ;;  %v960_v33 = vadd.f32 %v956_v29, %v937_v31 }
 0x3a0   :  { %v969_v20 = vadd.f32 %v968_v25, %v967_v32  ;;  %v965_v34 = vmul.f32 %v961_v27, %v953_v13 }
 0x3a1   :  { %v964_v37 = vmul.f32 %v960_v33, %v952_v15 }
 0x3a2   :  { %v972_v35 = vsel %vm966_vm7, %v965_v34, 0.0 }
 0x3a3   :  { %v970_v22 = vsel %vm966_vm7, %v964_v37, 0.0 }
 0x3a4   :  { %v971_v39 = vadd.f32 %v970_v22, %v969_v20 }
 0x3a6   :  { %v973_v40 = vadd.f32 %v972_v35, %v971_v39 }
 0x3a8   :  { %v974_v41 = vrot.slane %v973_v40, 4 }
 0x3aa   :  { %v975_v42 = vadd.f32 %v974_v41, %v973_v40 }
 0x3ac   :  { %v976_v28 = vrot.slane %v975_v42, 2 }
 0x3ae   :  { %v977_v45 = vadd.f32 %v976_v28, %v975_v42 }
 0x3b0   :  { %v978_v30 = vrot.slane %v977_v45, 1 }
 0x3b2   :  { %v979_v46 = vadd.f32 %v978_v30, %v977_v45 }
 0x3b4   :  { %981 = vst.msk [vmem:[#allocation2] sm:$0x1] %vm980_vm8, %v979_v46 }
 0x3b5   :  { %1247 = shalt.err (!%p1244_p4)
}
 0x3b6   :  { %s1248_s14 = scalar_lea.hbm %s1799_s9, 16 }
 0x3b7   :  { %p1249_p5 = scmp.ne.s32.totalorder %s1799_s9, %s1248_s14  ;;  %p1252_p6 = scmp.lt.u32.totalorder %s1248_s14, %s1799_s9 }
 0x3b9   :  { %p1254_p7 = pnand %p1252_p6, %p1249_p5 }
 0x3bb   :  { %1257 = shalt.err (!%p1254_p7)
}
 0x3bc   :  { %991 = dma.vmem_to_hbm [thread:$0]  %s989_s7, 16, %s1799_s9, [#allocation3]  }
 0x3bd   :  { %1258 = dma.done.wait [#allocation3], 16  }
 0x3be   :  { %1259 = vsyncadd [#allocation3], 4294967280 }
 0x3bf   :  { %995 = vsyncpa [#allocation3], 1 }

</bundles_post_ra>
